<compile_context>
chip_gen: v7x
topology: tpu7x:2x2x1
jax: 0.10.0
libtpu: 0.0.40
codegen_flags: <defaults>
</compile_context>

<pallas_src>
import functools
from math import sqrt

import jax
import jax.numpy as jnp
from jax.experimental import pallas as pl
from jax.experimental.pallas import tpu as pltpu


# ----------------------------------------------------------------------------
# helpers
# ----------------------------------------------------------------------------
def _round_up(n, m):
    return (n + m - 1) // m * m


def _cdiv(a, b):
    return (a + b - 1) // b


def _vmem_capacity_bytes():
    """Physical VMEM per TensorCore (trace-time query, with a safe fallback)."""
    try:
        return int(pltpu.get_tpu_info().vmem_capacity_bytes)
    except Exception:
        return 64 * 1024 * 1024  # conservative: v7x per-TC size


def _gelu(h, approximate):
    if approximate:
        # tanh-approx GELU: tanh lowers to the EUP slot (free next to vmatmul
        # on v6e/v7x); slight numerical deviation from torch.nn.GELU() default.
        c = 0.7978845608028654  # sqrt(2/pi)
        return 0.5 * h * (1.0 + jnp.tanh(c * (h + 0.044715 * h * h * h)))
    # Exact erf form == torch.nn.GELU() default numerics.
    return 0.5 * h * (1.0 + jax.lax.erf(h * (1.0 / sqrt(2.0))))


# ----------------------------------------------------------------------------
# kernels
# ----------------------------------------------------------------------------
def _ffn_resident_kernel(x_ref, w1_ref, b1_ref, w2_ref, b2_ref, o_ref, *,
                         compute_dtype, approximate):
    # Full W1/W2 resident in VMEM (constant index_map -> DMA'd once);
    # x/out stream as row tiles.  No hidden grid axis, no accumulator RMW.
    x = x_ref[...].astype(compute_dtype)
    h = jnp.dot(x, w1_ref[...], preferred_element_type=jnp.float32)
    h = _gelu(h + b1_ref[...], approximate)
    y = jnp.dot(h.astype(compute_dtype), w2_ref[...],
                preferred_element_type=jnp.float32)
    # Dropout: inference mode -> identity.
    o_ref[...] = (y + b2_ref[...]).astype(o_ref.dtype)


def _ffn_streaming_kernel(x_ref, w1_ref, b1_ref, w2_ref, b2_ref, o_ref,
                          acc_ref, *, compute_dtype, approximate):
    # Fallback for layers whose full weights do not fit VMEM: hidden axis is
    # the (last, "arbitrary") reduction axis; (tm, Dp) f32 accumulator.
    hj = pl.program_id(1)

    @pl.when(hj == 0)
    def _():
        acc_ref[...] = jnp.zeros_like(acc_ref)

    x = x_ref[...].astype(compute_dtype)
    h = jnp.dot(x, w1_ref[...], preferred_element_type=jnp.float32)
    h = _gelu(h + b1_ref[...], approximate)
    acc_ref[...] += jnp.dot(h.astype(compute_dtype), w2_ref[...],
                            preferred_element_type=jnp.float32)

    @pl.when(hj == pl.num_programs(1) - 1)
    def _():
        # Dropout: inference mode -> identity.
        o_ref[...] = (acc_ref[...] + b2_ref[...]).astype(o_ref.dtype)


# ----------------------------------------------------------------------------
# wrapper
# ----------------------------------------------------------------------------
def prepare_ffn_params(w1, b1, w2, b2, compute_dtype=jnp.bfloat16):
    """One-time pad (to multiples of 128) + cast of the FFN parameters.

    w1: (D, H), b1: (H,), w2: (H, D), b2: (D,)   -- (in, out) layout,
    i.e. the transpose of nn.Linear's stored (out, in) weight.
    """
    D, H = w1.shape
    Dp, Hp = _round_up(D, 128), _round_up(H, 128)
    w1p = jnp.pad(w1, ((0, Dp - D), (0, Hp - H))).astype(compute_dtype)
    w2p = jnp.pad(w2, ((0, Hp - H), (0, Dp - D))).astype(compute_dtype)
    b1p = jnp.pad(b1, (0, Hp - H)).reshape(1, Hp).astype(jnp.float32)
    b2p = jnp.pad(b2, (0, Dp - D)).reshape(1, Dp).astype(jnp.float32)
    return w1p, b1p, w2p, b2p


@functools.partial(
    jax.jit,
    static_argnames=("block_rows", "block_hidden", "compute_dtype",
                     "approximate_gelu", "out_dtype", "_force_path"))
def feed_forward(x, w1p, b1p, w2p, b2p, *, block_rows=None, block_hidden=1024,
                 compute_dtype=jnp.bfloat16, approximate_gelu=False,
                 out_dtype=None, _force_path=None):
    """x: (B, S, D); params from prepare_ffn_params(). Returns (B, S, D)."""
    B, S, D = x.shape
    Dp, Hp = w1p.shape
    M = B * S
    out_dtype = x.dtype if out_dtype is None else out_dtype

    cbytes = jnp.dtype(compute_dtype).itemsize
    xbytes = jnp.dtype(x.dtype).itemsize
    obytes = jnp.dtype(out_dtype).itemsize

    vmem_cap = _vmem_capacity_bytes()
    vmem_ceiling = int(0.78 * vmem_cap)          # headroom for Mosaic scratch

    if block_rows is None:
        # 128 MiB-VMEM chips (v5e/v6e) can afford much taller row tiles than
        # v7x's 64 MiB per TensorCore.
        block_rows = 1024 if vmem_cap >= (96 << 20) else 512

    # Balanced row tiles: tm ~= ceil(M / n_tiles), so padding waste is < 16
    # rows per tile instead of up to tm-1 rows with round_up(M, tm).
    n_row_tiles = max(1, _cdiv(M, block_rows))
    tm = _round_up(_cdiv(M, n_row_tiles), 16)
    M_pad = tm * n_row_tiles

    # Pad activations only when actually needed (each pad is a full HBM pass);
    # the cast to the MXU compute dtype happens inside the kernel.
    x2 = x.reshape(M, D)
    if M_pad != M or Dp != D:
        x2 = jnp.pad(x2, ((0, M_pad - M), (0, Dp - D)))

    # --- choose path: resident weights (1-D grid) vs streamed hidden chunks.
    resident_bytes = (
        2 * tm * Dp * xbytes          # x double-buffer (input dtype)
        + 2 * Dp * Hp * cbytes        # W1 + W2, resident
        + (Hp + Dp) * 4               # biases (f32)
        + 2 * tm * Dp * obytes        # out double-buffer
        + tm * Hp * (4 + cbytes)      # f32 GELU intermediate + compute-dtype copy
        + tm * Dp * 4)                # slack
    use_resident = resident_bytes <= int(0.6 * vmem_cap)
    if _force_path == "resident":
        use_resident = True
    elif _force_path == "streaming":
        use_resident = False

    if use_resident:
        vmem_limit = int(min(max(int(1.2 * resident_bytes), 32 << 20),
                             vmem_ceiling))
        cost = pl.CostEstimate(
            flops=4 * M_pad * Dp * Hp,
            transcendentals=M_pad * Hp,
            bytes_accessed=(M_pad * Dp * xbytes + 2 * Dp * Hp * cbytes
                            + (Hp + Dp) * 4 + M_pad * Dp * obytes))
        kernel = functools.partial(_ffn_resident_kernel,
                                   compute_dtype=compute_dtype,
                                   approximate=approximate_gelu)
        out = pl.pallas_call(
            kernel,
            out_shape=jax.ShapeDtypeStruct((M_pad, Dp), out_dtype),
            grid_spec=pltpu.PrefetchScalarGridSpec(
                num_scalar_prefetch=0,
                grid=(n_row_tiles,),
                in_specs=[
                    pl.BlockSpec((tm, Dp), lambda i: (i, 0)),   # x rows
                    pl.BlockSpec((Dp, Hp), lambda i: (0, 0)),   # W1 (resident)
                    pl.BlockSpec((1, Hp), lambda i: (0, 0)),    # b1
                    pl.BlockSpec((Hp, Dp), lambda i: (0, 0)),   # W2 (resident)
                    pl.BlockSpec((1, Dp), lambda i: (0, 0)),    # b2
                ],
                out_specs=pl.BlockSpec((tm, Dp), lambda i: (i, 0)),
            ),
            compiler_params=pltpu.CompilerParams(
                dimension_semantics=("parallel",),
                vmem_limit_bytes=vmem_limit),
            cost_estimate=cost,
        )(x2, w1p, b1p, w2p, b2p)
    else:
        # Hidden-chunk size: multiple of 128 that divides Hp, <= block_hidden.
        th = min(_round_up(block_hidden, 128), Hp)
        while Hp % th != 0:
            th -= 128
        n_h = Hp // th

        streaming_bytes = (
            2 * tm * Dp * xbytes              # x double-buffer
            + 2 * Dp * th * cbytes            # W1 chunks
            + 2 * th * Dp * cbytes            # W2 chunks
            + 2 * (th + Dp) * 4               # bias blocks
            + 2 * tm * Dp * obytes            # out double-buffer
            + tm * Dp * 4                     # f32 accumulator scratch
            + tm * th * (4 + cbytes))         # GELU intermediate
        vmem_limit = int(min(max(int(1.2 * streaming_bytes), 32 << 20),
                             vmem_ceiling))
        cost = pl.CostEstimate(
            flops=4 * M_pad * Dp * Hp,
            transcendentals=M_pad * Hp,
            # Weights are re-streamed once per row tile -> real DMA volume.
            bytes_accessed=(M_pad * Dp * xbytes
                            + n_row_tiles * 2 * Dp * Hp * cbytes
                            + (Hp + Dp) * 4 + M_pad * Dp * obytes))
        kernel = functools.partial(_ffn_streaming_kernel,
                                   compute_dtype=compute_dtype,
                                   approximate=approximate_gelu)
        out = pl.pallas_call(
            kernel,
            out_shape=jax.ShapeDtypeStruct((M_pad, Dp), out_dtype),
            grid_spec=pltpu.PrefetchScalarGridSpec(
                num_scalar_prefetch=0,
                grid=(n_row_tiles, n_h),
                in_specs=[
                    pl.BlockSpec((tm, Dp), lambda i, j: (i, 0)),   # x rows
                    pl.BlockSpec((Dp, th), lambda i, j: (0, j)),   # W1 chunk
                    pl.BlockSpec((1, th), lambda i, j: (0, j)),    # b1 chunk
                    pl.BlockSpec((th, Dp), lambda i, j: (j, 0)),   # W2 chunk
                    pl.BlockSpec((1, Dp), lambda i, j: (0, 0)),    # b2
                ],
                out_specs=pl.BlockSpec((tm, Dp), lambda i, j: (i, 0)),
                scratch_shapes=[pltpu.VMEM((tm, Dp), jnp.float32)],
            ),
            compiler_params=pltpu.CompilerParams(
                dimension_semantics=("parallel", "arbitrary"),
                vmem_limit_bytes=vmem_limit),
            cost_estimate=cost,
        )(x2, w1p, b1p, w2p, b2p)

    if M_pad != M or Dp != D:
        out = out[:M, :D]
    return out.reshape(B, S, D)


# ----------------------------------------------------------------------------
# reference + demo
# ----------------------------------------------------------------------------
def _reference(x, w1, b1, w2, b2):
    h = x @ w1 + b1
    h = 0.5 * h * (1.0 + jax.lax.erf(h / jnp.sqrt(2.0)))
    return h @ w2 + b2


if __name__ == "__main__":
    # Config: embedding_dim=32 -> hidden=128, dropout=0.1 (inactive in eval).
    B, S, D = 2, 8, 32
    H = 4 * D

    key = jax.random.PRNGKey(0)
    kx, k1, kb1, k2, kb2 = jax.random.split(key, 5)

    x = jax.random.normal(kx, (B, S, D), dtype=jnp.float32)

    # nn.Linear default init U(-1/sqrt(fan_in), ...), weights in (in, out) layout.
    lim1 = 1.0 / sqrt(D)
    w1 = jax.random.uniform(k1, (D, H), jnp.float32, -lim1, lim1)
    b1 = jax.random.uniform(kb1, (H,), jnp.float32, -lim1, lim1)
    lim2 = 1.0 / sqrt(H)
    w2 = jax.random.uniform(k2, (H, D), jnp.float32, -lim2, lim2)
    b2 = jax.random.uniform(kb2, (D,), jnp.float32, -lim2, lim2)

    # Pad/cast the weights ONCE (as a real model would at init).
    params = prepare_ffn_params(w1, b1, w2, b2)
    params = jax.block_until_ready(params)

    y_ref = _reference(x, w1, b1, w2, b2)

    # Default path (resident weights, exact-erf GELU == torch.nn.GELU()).
    y = jax.block_until_ready(feed_forward(x, *params))
    assert y.shape == (B, S, D)
    err = jnp.max(jnp.abs(y - y_ref))
    # bf16 MXU operands with f32 accumulation -> loosened tolerance vs f32 ref.
    assert jnp.allclose(y, y_ref, atol=5e-2, rtol=5e-2), (
        f"resident path mismatch vs reference (max abs err {err})")

    # Streaming fallback path (used for layers whose weights exceed VMEM).
    y_s = jax.block_until_ready(feed_forward(x, *params, _force_path="streaming"))
    err_s = jnp.max(jnp.abs(y_s - y_ref))
    assert jnp.allclose(y_s, y_ref, atol=5e-2, rtol=5e-2), (
        f"streaming path mismatch vs reference (max abs err {err_s})")

    # tanh-approx GELU option (EUP slot; recommended on v6e/v7x once MXU-bound).
    y_a = jax.block_until_ready(feed_forward(x, *params, approximate_gelu=True))
    err_a = jnp.max(jnp.abs(y_a - y_ref))
    assert jnp.allclose(y_a, y_ref, atol=5e-2, rtol=5e-2), (
        f"approx-GELU path mismatch vs reference (max abs err {err_a})")

    print("KERNEL_OK")
</pallas_src>

<mosaic_0001>
module attributes {stable_mosaic.version = 11 : i64} {
  func.func @_ffn_resident_kernel(%arg0: i32, %arg1: memref<16x128xf32, #tpu.memory_space<vmem>>, %arg2: memref<128x128xbf16, #tpu.memory_space<vmem>>, %arg3: memref<1x128xf32, #tpu.memory_space<vmem>>, %arg4: memref<128x128xbf16, #tpu.memory_space<vmem>>, %arg5: memref<1x128xf32, #tpu.memory_space<vmem>>, %arg6: memref<16x128xf32, #tpu.memory_space<vmem>>) attributes {dimension_semantics = [#tpu.dimension_semantics<parallel>], iteration_bounds = array<i64: 1>, scalar_prefetch = 0 : i64, scratch_operands = 0 : i64, tpu.core_type = #tpu.core_type<tc>, window_params = [{transform_indices = @transform_0, window_bounds = array<i64: 16, 128>}, {pipeline_mode = #tpu.pipeline_mode<synchronous>, transform_indices = @transform_1, window_bounds = array<i64: 128, 128>}, {pipeline_mode = #tpu.pipeline_mode<synchronous>, transform_indices = @transform_2, window_bounds = array<i64: 1, 128>}, {pipeline_mode = #tpu.pipeline_mode<synchronous>, transform_indices = @transform_3, window_bounds = array<i64: 128, 128>}, {pipeline_mode = #tpu.pipeline_mode<synchronous>, transform_indices = @transform_4, window_bounds = array<i64: 1, 128>}, {transform_indices = @transform_5, window_bounds = array<i64: 16, 128>}]} {
    %c0 = arith.constant 0 : index
    %c0_0 = arith.constant 0 : index
    %0 = vector.load %arg1[%c0, %c0_0] : memref<16x128xf32, #tpu.memory_space<vmem>>, vector<16x128xf32>
    %1 = arith.truncf %0 : vector<16x128xf32> to vector<16x128xbf16>
    %c0_1 = arith.constant 0 : index
    %c0_2 = arith.constant 0 : index
    %2 = vector.load %arg2[%c0_1, %c0_2] : memref<128x128xbf16, #tpu.memory_space<vmem>>, vector<128x128xbf16>
    %cst = arith.constant dense<0.000000e+00> : vector<16x128xf32>
    %3 = tpu.matmul %1, %2, %cst {dimension_numbers = #tpu.dot_dimension_numbers<[1], [0], [0], [1], [0, 0, 1, 1], [], []>} : vector<16x128xbf16>, vector<128x128xbf16>, vector<16x128xf32> -> vector<16x128xf32>
    %c0_3 = arith.constant 0 : index
    %c0_4 = arith.constant 0 : index
    %4 = vector.load %arg3[%c0_3, %c0_4] : memref<1x128xf32, #tpu.memory_space<vmem>>, vector<1x128xf32>
    %5 = vector.broadcast %4 : vector<1x128xf32> to vector<16x128xf32>
    %6 = arith.addf %3, %5 : vector<16x128xf32>
    %cst_5 = arith.constant 5.000000e-01 : f32
    %7 = vector.broadcast %cst_5 : f32 to vector<16x128xf32>
    %8 = arith.mulf %7, %6 : vector<16x128xf32>
    %cst_6 = arith.constant 0.707106769 : f32
    %9 = vector.broadcast %cst_6 : f32 to vector<16x128xf32>
    %10 = arith.mulf %6, %9 : vector<16x128xf32>
    %11 = math.erf %10 : vector<16x128xf32>
    %cst_7 = arith.constant 1.000000e+00 : f32
    %12 = vector.broadcast %cst_7 : f32 to vector<16x128xf32>
    %13 = arith.addf %12, %11 : vector<16x128xf32>
    %14 = arith.mulf %8, %13 : vector<16x128xf32>
    %15 = arith.truncf %14 : vector<16x128xf32> to vector<16x128xbf16>
    %c0_8 = arith.constant 0 : index
    %c0_9 = arith.constant 0 : index
    %16 = vector.load %arg4[%c0_8, %c0_9] : memref<128x128xbf16, #tpu.memory_space<vmem>>, vector<128x128xbf16>
    %cst_10 = arith.constant dense<0.000000e+00> : vector<16x128xf32>
    %17 = tpu.matmul %15, %16, %cst_10 {dimension_numbers = #tpu.dot_dimension_numbers<[1], [0], [0], [1], [0, 0, 1, 1], [], []>} : vector<16x128xbf16>, vector<128x128xbf16>, vector<16x128xf32> -> vector<16x128xf32>
    %c0_11 = arith.constant 0 : index
    %c0_12 = arith.constant 0 : index
    %18 = vector.load %arg5[%c0_11, %c0_12] : memref<1x128xf32, #tpu.memory_space<vmem>>, vector<1x128xf32>
    %19 = vector.broadcast %18 : vector<1x128xf32> to vector<16x128xf32>
    %20 = arith.addf %17, %19 : vector<16x128xf32>
    %c0_13 = arith.constant 0 : index
    %c0_14 = arith.constant 0 : index
    %21 = vector.load %arg6[%c0_13, %c0_14] : memref<16x128xf32, #tpu.memory_space<vmem>>, vector<16x128xf32>
    tpu.vector_store %arg6[%c0_13, %c0_14], %20 {strides = array<i32>} : memref<16x128xf32, #tpu.memory_space<vmem>>, vector<16x128xf32>,
    return
  }
  func.func @transform_0(%arg0: i32) -> (i32, i32) {
    %c0_i32 = arith.constant 0 : i32
    %c0_i32_0 = arith.constant 0 : i32
    return %arg0, %c0_i32 : i32, i32
  }
  func.func @transform_1(%arg0: i32) -> (i32, i32) {
    %c0_i32 = arith.constant 0 : i32
    %c0_i32_0 = arith.constant 0 : i32
    %c0_i32_1 = arith.constant 0 : i32
    return %c0_i32, %c0_i32_0 : i32, i32
  }
  func.func @transform_2(%arg0: i32) -> (i32, i32) {
    %c0_i32 = arith.constant 0 : i32
    %c0_i32_0 = arith.constant 0 : i32
    %c0_i32_1 = arith.constant 0 : i32
    return %c0_i32, %c0_i32_0 : i32, i32
  }
  func.func @transform_3(%arg0: i32) -> (i32, i32) {
    %c0_i32 = arith.constant 0 : i32
    %c0_i32_0 = arith.constant 0 : i32
    %c0_i32_1 = arith.constant 0 : i32
    return %c0_i32, %c0_i32_0 : i32, i32
  }
  func.func @transform_4(%arg0: i32) -> (i32, i32) {
    %c0_i32 = arith.constant 0 : i32
    %c0_i32_0 = arith.constant 0 : i32
    %c0_i32_1 = arith.constant 0 : i32
    return %c0_i32, %c0_i32_0 : i32, i32
  }
  func.func @transform_5(%arg0: i32) -> (i32, i32) {
    %c0_i32 = arith.constant 0 : i32
    %c0_i32_0 = arith.constant 0 : i32
    return %arg0, %c0_i32 : i32, i32
  }
}

</mosaic_0001>

<bundles_post_ra>
// kernel: feed_forward.1
= control target key start
LH: loop header
LB: loop body
LE: loop exit
PB: predicated region body
PF: predicated region fallthrough
CT: control target
= control target key end

     0   :  { %10 = vsyncpa [#allocation3], 0  ;;  %s523_s0 = inlined_call_operand.vmem [shape: f32[16,128], index: 0, kind: input, shape index: {}]   ;;  %s524_s1 = inlined_call_operand.hbm [shape: bf16[128,128], index: 1, kind: input, shape index: {}]   ;;  %s525_s2 = inlined_call_operand.vmem [shape: f32[1,128], index: 2, kind: input, shape index: {}]   ;;  %s526_s3 = inlined_call_operand.hbm [shape: bf16[128,128], index: 3, kind: input, shape index: {}]   ;;  %s527_s4 = inlined_call_operand.vmem [shape: f32[1,128], index: 4, kind: input, shape index: {}]   ;;  %s528_s5 = inlined_call_operand.vmem [shape: f32[16,128], index: 5, kind: output, shape index: {}]  }
   0x1   :  { %11 = vsyncpa [#allocation5], 0  ;;  %s445_s18 = smov [#allocation2]   ;;  %s397_s22 = scalar_lea.hbm %s524_s1, 1024 }
   0x2   :  { %s19_s19 = sshll.u32 %s445_s18, 4  ;;  %p398_p0 = scmp.ne.s32.totalorder %s524_s1, %s397_s22  ;;  %s20_s19 = int_to_ptr.vmem [resolvable:$true] %s19_s19 }
   0x3   :  { %p401_p1 = scmp.lt.u32.totalorder %s397_s22, %s524_s1 }
   0x5   :  { %p403_p2 = pnand %p401_p1, %p398_p0 }
   0x7   :  { %406 = shalt.err (!%p403_p2)
}
   0x8   :  { %s407_s27 = scalar_lea.vmem %s20_s19, 1024  ;;  %p412_p4 = scmp.lt.s32.totalorder %s20_s19, %s20_s19 }
   0x9   :  { %p408_p3 = scmp.ne.s32.totalorder %s20_s19, %s407_s27  ;;  %p413_p5 = scmp.lt.s32.totalorder %s407_s27, %s407_s27 }
   0xb   :  { %p414_p6 = por %p413_p5, %p412_p4 }
   0xd   :  { %p415_p7 = pnand %p414_p6, %p408_p3 }
   0xf   :  { %418 = shalt.err (!%p415_p7)
}
  0x10   :  { %s446_s28 = smov 64   ;;  %s447_s29 = smov 4  }
  0x11   :  { %25 = dma.hbm_to_vmem [thread:$0]  %s524_s1, 1024, %s20_s19, [#allocation3], %s446_s28, %s446_s28, %s447_s29  }
  0x12   :  { %s448_s7 = smov [#allocation4]   ;;  %s419_s11 = scalar_lea.hbm %s526_s3, 1024 }
  0x13   :  { %s33_s8 = sshll.u32 %s448_s7, 4  ;;  %p420_p8 = scmp.ne.s32.totalorder %s526_s3, %s419_s11  ;;  %s34_s8 = int_to_ptr.vmem [resolvable:$true] %s33_s8 }
  0x14   :  { %p423_p9 = scmp.lt.u32.totalorder %s419_s11, %s526_s3 }
  0x16   :  { %p425_p10 = pnand %p423_p9, %p420_p8 }
  0x18   :  { %428 = shalt.err (!%p425_p10)
}
  0x19   :  { %s429_s16 = scalar_lea.vmem %s34_s8, 1024  ;;  %p434_p12 = scmp.lt.s32.totalorder %s34_s8, %s34_s8 }
  0x1a   :  { %p430_p11 = scmp.ne.s32.totalorder %s34_s8, %s429_s16  ;;  %p435_p13 = scmp.lt.s32.totalorder %s429_s16, %s429_s16 }
  0x1c   :  { %p436_p0 = por %p435_p13, %p434_p12 }
  0x1e   :  { %p437_p1 = pnand %p436_p0, %p430_p11 }
  0x20   :  { %440 = shalt.err (!%p437_p1)
}
  0x21   :  { %39 = dma.hbm_to_vmem [thread:$0]  %s526_s3, 1024, %s34_s8, [#allocation5], %s446_s28, %s446_s28, %s447_s29  }
  0x22   :  { %441 = dma.done.wait [#allocation3], 1024  }
  0x23   :  { %442 = vsyncadd [#allocation3], 4294966272 }
  0x24   :  { %443 = dma.done.wait [#allocation5], 1024  }
  0x25   :  { %444 = vsyncadd [#allocation5], 4294966272  ;;  %v449_v0 = vmov 0.0   ;;  %vm450_vm0 = vmmov 0   ;;  %v377_v1 = vld [vmem:[#allocation2] sm:$0xff]   ;;  %v378_v2 = vld [vmem:[#allocation2 + $0x8] sm:$0xff]  }
  0x26   :  { %331 = vmatprep.subr.bf16.mxu0 %v449_v0  ;;  %347 = vmatprep.mubr.msk.bf16.mxu0 %vm450_vm0, %v449_v0  ;;  %v379_v3 = vld [vmem:[#allocation2 + $0x10] sm:$0xff]   ;;  %v385_v4 = vld [vmem:[#allocation4] sm:$0xff]   ;;  %v380_v5 = vld [vmem:[#allocation2 + $0x18] sm:$0xff]  }
  0x27   :  { %351 = vmatprep.subr.bf16.mxu1 %v449_v0  ;;  %367 = vmatprep.mubr.msk.bf16.mxu1 %vm450_vm0, %v449_v0  ;;  %v386_v6 = vld [vmem:[#allocation4 + $0x8] sm:$0xff]   ;;  %v381_v7 = vld [vmem:[#allocation2 + $0x20] sm:$0xff]   ;;  %v383_v9 = vld [vmem:[#allocation2 + $0x30] sm:$0xff]  }
  0x28   :  { %332 = vmatpush3.bf16.msra.mxu0 %v377_v1  ;;  %352 = vmatpush3.bf16.msra.mxu1 %v385_v4  ;;  %v382_v8 = vld [vmem:[#allocation2 + $0x28] sm:$0xff]   ;;  %v384_v10 = vld [vmem:[#allocation2 + $0x38] sm:$0xff]   ;;  %v49_v11 = vld [vmem:[%s523_s0] sm:$0xff] }
  0x29   :  { %333 = vmatprep.subr.bf16.mxu0 %v449_v0  ;;  %353 = vmatprep.subr.bf16.mxu1 %v449_v0  ;;  %v50_v12 = vld [vmem:[%s523_s0 + $0x8] sm:$0xff]  ;;  %v387_v14 = vld [vmem:[#allocation4 + $0x10] sm:$0xff]   ;;  %v388_v15 = vld [vmem:[#allocation4 + $0x18] sm:$0xff]  }
  0x2a   :  { %v51_v13 = vpack.c.bf16 %v50_v12, %v49_v11  ;;  %v389_v16 = vld [vmem:[#allocation4 + $0x20] sm:$0xff]   ;;  %v390_v17 = vld [vmem:[#allocation4 + $0x28] sm:$0xff]   ;;  %v391_v18 = vld [vmem:[#allocation4 + $0x30] sm:$0xff]  }
  0x2b   :  { %v392_v19 = vld [vmem:[#allocation4 + $0x38] sm:$0xff]   ;;  %v295_v20 = vld [vmem:[%s525_s2] ss:$0 sm:$0xff] }
  0x2c   :  { %334 = vmatpush3.bf16.msra.mxu0 %v378_v2  ;;  %354 = vmatpush3.bf16.msra.mxu1 %v386_v6  ;;  %v304_v38 = vld [vmem:[%s527_s4] ss:$0 sm:$0xff] }
  0x2d   :  { %335 = vmatprep.subr.bf16.mxu0 %v449_v0  ;;  %355 = vmatprep.subr.bf16.mxu1 %v449_v0 }
  0x30   :  { %336 = vmatpush3.bf16.msra.mxu0 %v379_v3  ;;  %356 = vmatpush3.bf16.msra.mxu1 %v387_v14 }
  0x31   :  { %337 = vmatprep.subr.bf16.mxu0 %v449_v0  ;;  %357 = vmatprep.subr.bf16.mxu1 %v449_v0 }
  0x34   :  { %338 = vmatpush3.bf16.msra.mxu0 %v380_v5  ;;  %358 = vmatpush3.bf16.msra.mxu1 %v388_v15 }
  0x35   :  { %339 = vmatprep.subr.bf16.mxu0 %v449_v0  ;;  %359 = vmatprep.subr.bf16.mxu1 %v449_v0 }
  0x38   :  { %340 = vmatpush3.bf16.msra.mxu0 %v381_v7  ;;  %360 = vmatpush3.bf16.msra.mxu1 %v389_v16 }
  0x39   :  { %341 = vmatprep.subr.bf16.mxu0 %v449_v0  ;;  %361 = vmatprep.subr.bf16.mxu1 %v449_v0 }
  0x3c   :  { %342 = vmatpush3.bf16.msra.mxu0 %v382_v8  ;;  %362 = vmatpush3.bf16.msra.mxu1 %v390_v17 }
  0x3d   :  { %343 = vmatprep.subr.bf16.mxu0 %v449_v0  ;;  %363 = vmatprep.subr.bf16.mxu1 %v449_v0 }
  0x40   :  { %344 = vmatpush3.bf16.msra.mxu0 %v383_v9  ;;  %364 = vmatpush3.bf16.msra.mxu1 %v391_v18 }
  0x41   :  { %345 = vmatprep.subr.bf16.mxu0 %v449_v0  ;;  %365 = vmatprep.subr.bf16.mxu1 %v449_v0 }
  0x44   :  { %346 = vmatpush3.bf16.msra.mxu0 %v384_v10  ;;  %366 = vmatpush3.bf16.msra.mxu1 %v392_v19 }
  0x47   :  { %348 = vmatmul.mubr.bf16.vlgmr.msra.gmra.mrb[0].mxu0 %v51_v13 }
 0x11a   :  { %v157_v21 = vpop.f32.mrb[0].mxu0 }
 0x11b   :  { %v158_v22 = vadd.f32 %v295_v20, %v157_v21  ;;  %v349_v23 = vpop.f32.mrb[1].mxu0 }
 0x11c   :  { %v160_v24 = vpop.f32.mrb[2].mxu0 }
 0x11d   :  { %v166_v25 = vmul.f32 0.70710677, %v158_v22  ;;  %v161_v26 = vadd.f32 %v295_v20, %v160_v24  ;;  %v350_v27 = vpop.f32.mrb[3].mxu0  ;;  %v164_v32 = vmul.f32 0.5, %v158_v22 }
 0x11f   :  { %393 = verf.f32 %v166_v25  ;;  %v167_v28 = vmul.f32 0.70710677, %v161_v26  ;;  %v165_v33 = vmul.f32 0.5, %v161_v26 }
 0x121   :  { %395 = verf.f32 %v167_v28 }
 0x129   :  { %v394_v29 = vpop.eup %393 }
 0x12a   :  { %v170_v30 = vadd.f32 1.0, %v394_v29 }
 0x12b   :  { %v396_v31 = vpop.eup %395 }
 0x12c   :  { %v171_v34 = vadd.f32 1.0, %v396_v31  ;;  %v172_v35 = vmul.f32 %v170_v30, %v164_v32 }
 0x12e   :  { %v173_v36 = vmul.f32 %v171_v34, %v165_v33 }
 0x130   :  { %v174_v37 = vpack.c.bf16 %v173_v36, %v172_v35 }
 0x132   :  { %368 = vmatmul.mubr.bf16.vlgmr.msra.gmra.mrb[0].mxu1 %v174_v37 }
 0x205   :  { %v280_v39 = vpop.f32.mrb[0].mxu1 }
 0x206   :  { %v281_v40 = vadd.f32 %v304_v38, %v280_v39  ;;  %v369_v41 = vpop.f32.mrb[1].mxu1 }
 0x207   :  { %v283_v42 = vpop.f32.mrb[2].mxu1 }
 0x208   :  { %287 = vst [vmem:[%s528_s5] sm:$0xff] %v281_v40  ;;  %v284_v43 = vadd.f32 %v304_v38, %v283_v42  ;;  %v370_v44 = vpop.f32.mrb[3].mxu1 }
 0x20a   :  { %288 = vst [vmem:[%s528_s5 + $0x8] sm:$0xff] %v284_v43 }
 0x20b   :  { %293 = vsyncpa [#allocation3], 1 }
 0x20c   :  { %294 = vsyncpa [#allocation5], 1 }

</bundles_post_ra>
